<compile_context>
chip_gen: v7x
topology: tpu7x:2x2x1
jax: 0.10.0
libtpu: 0.0.40
codegen_flags: <defaults>
</compile_context>

<pallas_src>
import functools

import jax
import jax.numpy as jnp
from jax import lax
from jax.experimental import pallas as pl
from jax.experimental.pallas import tpu as pltpu


# --------------------------------------------------------------------------- #
# Helpers
# --------------------------------------------------------------------------- #
def _round_up(x, m):
    return (x + m - 1) // m * m


def _vmem_limit_bytes():
    # Right-size the scoped VMEM limit per generation (v5e/v6e: 128 MiB physical,
    # v7x: 64 MiB). Fall back conservatively if the query is unavailable.
    cap = None
    try:
        info = pltpu.get_tpu_info()
        cap = getattr(info, "vmem_capacity_bytes", None)
    except Exception:
        cap = None
    if not cap:
        cap = 64 * 1024 * 1024
    return int(min(cap * 3 // 4, 96 * 1024 * 1024))


_VMEM_LIMIT = _vmem_limit_bytes()

# Padded node count up to which the fully fused single-kernel path is used.
# At n_p = 1024: adj (4 MiB f32) + A_pred (4 MiB) + activations (<3 MiB) fits
# comfortably even on v7x's 64 MiB VMEM.
_FUSED_MAX_NP = 1024


def _pick_tile(n_pad):
    # n_pad is a multiple of 512 on the tiled path; prefer the largest tile.
    for t in (1024, 512, 256, 128):
        if n_pad % t == 0:
            return t
    return 128


def _pad2d(a, rows, cols):
    r, c = a.shape
    return jnp.pad(a, ((0, rows - r), (0, cols - c)))


def _normalize_rows(g):
    # F.normalize(p=2, dim=1): sqrt(max(sumsq,1e-24)) == max(||g||, 1e-12);
    # rsqrt keeps this on the EUP.
    sumsq = jnp.sum(g * g, axis=1, keepdims=True)
    return g * lax.rsqrt(jnp.maximum(sumsq, 1e-24))


# --------------------------------------------------------------------------- #
# Fused small-graph kernel (everything in one pallas_call)
# --------------------------------------------------------------------------- #
def _fused_kernel(x_ref, adj_ref, wf_ref, bf_ref, wg_ref,
                  a_ref, emb_ref, xt_ref, *, times, compute_dtype):
    # fcn
    xt = jnp.dot(x_ref[...], wf_ref[...],
                 preferred_element_type=jnp.float32) + bf_ref[...]
    xt_ref[...] = xt.astype(xt_ref.dtype)

    # GFilter smoothing: h = adj_norm^times @ xt (times static -> unrolled,
    # always adj @ (adj @ ...), never adj^times).
    adj = adj_ref[...]
    if adj.dtype != compute_dtype:
        adj = adj.astype(compute_dtype)
    h = xt
    for _ in range(times):
        h = jnp.dot(adj, h.astype(compute_dtype),
                    preferred_element_type=jnp.float32)

    # gcn linear + ReLU + L2 row-normalization
    g = jnp.maximum(jnp.dot(h, wg_ref[...],
                            preferred_element_type=jnp.float32), 0.0)
    emb = _normalize_rows(g)
    emb_ref[...] = emb.astype(emb_ref.dtype)

    # dot-product decode (contract last axes, no explicit transpose)
    logits = lax.dot_general(emb, emb,
                             dimension_numbers=(((1,), (1,)), ((), ())),
                             preferred_element_type=jnp.float32)
    a_ref[...] = jax.nn.sigmoid(logits).astype(a_ref.dtype)


def _fused_forward(xp, adjp, wfp, bfp, wgp, times, compute_dtype):
    n_p, k_p = xp.shape
    l_p = wfp.shape[1]
    e_p = wgp.shape[1]
    kernel = functools.partial(_fused_kernel, times=times,
                               compute_dtype=compute_dtype)
    return pl.pallas_call(
        kernel,
        out_shape=(jax.ShapeDtypeStruct((n_p, n_p), jnp.float32),
                   jax.ShapeDtypeStruct((n_p, e_p), jnp.float32),
                   jax.ShapeDtypeStruct((n_p, l_p), jnp.float32)),
        grid=(1,),
        in_specs=[
            pl.BlockSpec((n_p, k_p), lambda i: (0, 0)),
            pl.BlockSpec((n_p, n_p), lambda i: (0, 0)),
            pl.BlockSpec((k_p, l_p), lambda i: (0, 0)),
            pl.BlockSpec((1, l_p), lambda i: (0, 0)),
            pl.BlockSpec((l_p, e_p), lambda i: (0, 0)),
        ],
        out_specs=(pl.BlockSpec((n_p, n_p), lambda i: (0, 0)),
                   pl.BlockSpec((n_p, e_p), lambda i: (0, 0)),
                   pl.BlockSpec((n_p, l_p), lambda i: (0, 0))),
        compiler_params=pltpu.CompilerParams(
            dimension_semantics=("arbitrary",),
            vmem_limit_bytes=_VMEM_LIMIT),
    )(xp, adjp, wfp, bfp, wgp)


# --------------------------------------------------------------------------- #
# Tiled large-graph kernels
# --------------------------------------------------------------------------- #
def _fcn_kernel(x_ref, wf_ref, bf_ref, xt_ref):
    xt = jnp.dot(x_ref[...], wf_ref[...], preferred_element_type=jnp.float32)
    xt_ref[...] = (xt + bf_ref[...]).astype(xt_ref.dtype)


def _smooth_kernel(adj_ref, h_ref, out_ref, acc_ref, *, tk, compute_dtype):
    # One smoothing step out = adj_norm @ h, tiled over (row tile i, k tile).
    # h is a full-size resident VMEM block (constant index_map) -> fetched once,
    # sliced here instead of being re-streamed per row tile.
    k = pl.program_id(1)

    @pl.when(k == 0)
    def _():
        acc_ref[...] = jnp.zeros_like(acc_ref)

    start = pl.multiple_of(k * tk, tk)
    h_blk = h_ref[pl.ds(start, tk), :]
    if h_blk.dtype != compute_dtype:
        h_blk = h_blk.astype(compute_dtype)
    acc_ref[...] += jnp.dot(adj_ref[...], h_blk,
                            preferred_element_type=jnp.float32)

    @pl.when(k == pl.num_programs(1) - 1)
    def _():
        out_ref[...] = acc_ref[...].astype(out_ref.dtype)


def _smooth_gcn_norm_kernel(adj_ref, h_ref, wg_ref, emb_ref, acc_ref,
                            *, tk, compute_dtype):
    # Final smoothing step with the gcn matmul + ReLU + L2-normalize fused
    # into the k == last epilogue (saves one h round trip through HBM).
    k = pl.program_id(1)

    @pl.when(k == 0)
    def _():
        acc_ref[...] = jnp.zeros_like(acc_ref)

    start = pl.multiple_of(k * tk, tk)
    h_blk = h_ref[pl.ds(start, tk), :]
    if h_blk.dtype != compute_dtype:
        h_blk = h_blk.astype(compute_dtype)
    acc_ref[...] += jnp.dot(adj_ref[...], h_blk,
                            preferred_element_type=jnp.float32)

    @pl.when(k == pl.num_programs(1) - 1)
    def _():
        g = jnp.maximum(jnp.dot(acc_ref[...], wg_ref[...],
                                preferred_element_type=jnp.float32), 0.0)
        emb_ref[...] = _normalize_rows(g).astype(emb_ref.dtype)


def _gcn_norm_kernel(h_ref, wg_ref, emb_ref):
    # Only used when times == 0 (no smoothing step to fuse into).
    g = jnp.maximum(jnp.dot(h_ref[...], wg_ref[...],
                            preferred_element_type=jnp.float32), 0.0)
    emb_ref[...] = _normalize_rows(g).astype(emb_ref.dtype)


def _decode_kernel(zi_ref, zj_ref, a_ref):
    logits = lax.dot_general(zi_ref[...], zj_ref[...],
                             dimension_numbers=(((1,), (1,)), ((), ())),
                             preferred_element_type=jnp.float32)
    a_ref[...] = jax.nn.sigmoid(logits).astype(a_ref.dtype)


# --------------------------------------------------------------------------- #
# Tiled pallas_call wrappers
# --------------------------------------------------------------------------- #
def _fcn(xp, wfp, bfp, tm):
    n_p, k_p = xp.shape
    l_p = wfp.shape[1]
    return pl.pallas_call(
        _fcn_kernel,
        out_shape=jax.ShapeDtypeStruct((n_p, l_p), jnp.float32),
        grid=(n_p // tm,),
        in_specs=[
            pl.BlockSpec((tm, k_p), lambda i: (i, 0)),
            pl.BlockSpec((k_p, l_p), lambda i: (0, 0)),
            pl.BlockSpec((1, l_p), lambda i: (0, 0)),
        ],
        out_specs=pl.BlockSpec((tm, l_p), lambda i: (i, 0)),
        compiler_params=pltpu.CompilerParams(
            dimension_semantics=("parallel",),
            vmem_limit_bytes=_VMEM_LIMIT),
    )(xp, wfp, bfp)


def _smooth_step(adjp, hp, tm, tk, compute_dtype):
    n_p = adjp.shape[0]
    l_p = hp.shape[1]
    kernel = functools.partial(_smooth_kernel, tk=tk, compute_dtype=compute_dtype)
    return pl.pallas_call(
        kernel,
        out_shape=jax.ShapeDtypeStruct((n_p, l_p), jnp.float32),
        grid=(n_p // tm, n_p // tk),
        in_specs=[
            pl.BlockSpec((tm, tk), lambda i, k: (i, k)),      # adjacency stream
            pl.BlockSpec((n_p, l_p), lambda i, k: (0, 0)),    # resident h
        ],
        out_specs=pl.BlockSpec((tm, l_p), lambda i, k: (i, 0)),
        scratch_shapes=[pltpu.VMEM((tm, l_p), jnp.float32)],
        compiler_params=pltpu.CompilerParams(
            dimension_semantics=("parallel", "arbitrary"),
            vmem_limit_bytes=_VMEM_LIMIT),
    )(adjp, hp)


def _smooth_gcn_normalize(adjp, hp, wgp, tm, tk, compute_dtype):
    n_p = adjp.shape[0]
    l_p = hp.shape[1]
    e_p = wgp.shape[1]
    kernel = functools.partial(_smooth_gcn_norm_kernel, tk=tk,
                               compute_dtype=compute_dtype)
    return pl.pallas_call(
        kernel,
        out_shape=jax.ShapeDtypeStruct((n_p, e_p), jnp.float32),
        grid=(n_p // tm, n_p // tk),
        in_specs=[
            pl.BlockSpec((tm, tk), lambda i, k: (i, k)),      # adjacency stream
            pl.BlockSpec((n_p, l_p), lambda i, k: (0, 0)),    # resident h
            pl.BlockSpec((l_p, e_p), lambda i, k: (0, 0)),    # W_gcn (resident)
        ],
        out_specs=pl.BlockSpec((tm, e_p), lambda i, k: (i, 0)),
        scratch_shapes=[pltpu.VMEM((tm, l_p), jnp.float32)],
        compiler_params=pltpu.CompilerParams(
            dimension_semantics=("parallel", "arbitrary"),
            vmem_limit_bytes=_VMEM_LIMIT),
    )(adjp, hp, wgp)


def _gcn_normalize(hp, wgp, tm):
    n_p, l_p = hp.shape
    e_p = wgp.shape[1]
    return pl.pallas_call(
        _gcn_norm_kernel,
        out_shape=jax.ShapeDtypeStruct((n_p, e_p), jnp.float32),
        grid=(n_p // tm,),
        in_specs=[
            pl.BlockSpec((tm, l_p), lambda i: (i, 0)),
            pl.BlockSpec((l_p, e_p), lambda i: (0, 0)),
        ],
        out_specs=pl.BlockSpec((tm, e_p), lambda i: (i, 0)),
        compiler_params=pltpu.CompilerParams(
            dimension_semantics=("parallel",),
            vmem_limit_bytes=_VMEM_LIMIT),
    )(hp, wgp)


def _decode(embp, tm, tn):
    n_p, e_p = embp.shape
    return pl.pallas_call(
        _decode_kernel,
        out_shape=jax.ShapeDtypeStruct((n_p, n_p), jnp.float32),
        grid=(n_p // tm, n_p // tn),
        in_specs=[
            pl.BlockSpec((tm, e_p), lambda i, j: (i, 0)),
            pl.BlockSpec((tn, e_p), lambda i, j: (j, 0)),
        ],
        out_specs=pl.BlockSpec((tm, tn), lambda i, j: (i, j)),
        compiler_params=pltpu.CompilerParams(
            dimension_semantics=("parallel", "parallel"),
            vmem_limit_bytes=_VMEM_LIMIT),
    )(embp, embp)


# --------------------------------------------------------------------------- #
# Forward
# --------------------------------------------------------------------------- #
@functools.partial(jax.jit, static_argnames=("times", "compute_dtype"))
def egae_forward(x, adj_norm, w_fcn, b_fcn, w_gcn, times,
                 compute_dtype=jnp.float32):
    """x: [N, input_dim], adj_norm: [N, N].
    w_fcn: [input_dim, linear_dim] (already transposed from PyTorch layout),
    b_fcn: [1, linear_dim], w_gcn: [linear_dim, embedding_dim].
    compute_dtype: MXU input dtype for the smoothing matmuls (f32 preserves the
    exact module semantics; bf16 halves the dominant adjacency HBM stream)."""
    n, k = x.shape
    l = w_fcn.shape[1]
    e = w_gcn.shape[1]

    k_p = _round_up(k, 128)
    l_p = _round_up(l, 128)
    e_p = _round_up(e, 128)

    n_p = _round_up(n, 128)
    fused = n_p <= _FUSED_MAX_NP
    if not fused:
        # Tiled path: pad to a multiple of 512 so row/col/k tiles never fall
        # back to 128 (lane-dense adjacency stream and decode output).
        n_p = _round_up(n, 512)

    xp = _pad2d(x.astype(jnp.float32), n_p, k_p)
    adjp = _pad2d(adj_norm.astype(jnp.float32), n_p, n_p)
    if compute_dtype != jnp.float32:
        # Cast the adjacency once; the smoothing accumulation stays f32.
        adjp = adjp.astype(compute_dtype)
    wfp = _pad2d(w_fcn.astype(jnp.float32), k_p, l_p)
    bfp = _pad2d(b_fcn.astype(jnp.float32).reshape(1, -1), 1, l_p)
    wgp = _pad2d(w_gcn.astype(jnp.float32), l_p, e_p)

    if fused:
        a_pred_p, emb_p, xt_p = _fused_forward(xp, adjp, wfp, bfp, wgp,
                                               times, compute_dtype)
    else:
        tm = _pick_tile(n_p)
        tk = tm

        # fcn
        xt_p = _fcn(xp, wfp, bfp, tm)

        # GFilter smoothing (times static -> unrolled), final step fused with
        # the gcn linear + ReLU + normalize epilogue.
        h = xt_p
        if times == 0:
            emb_p = _gcn_normalize(h, wgp, tm)
        else:
            for _ in range(times - 1):
                h = _smooth_step(adjp, h, tm, tk, compute_dtype)
            emb_p = _smooth_gcn_normalize(adjp, h, wgp, tm, tk, compute_dtype)

        # dot-product decode
        a_pred_p = _decode(emb_p, tm, tm)

    return a_pred_p[:n, :n], emb_p[:n, :e], xt_p[:n, :l]


# --------------------------------------------------------------------------- #
# Pure-JAX reference
# --------------------------------------------------------------------------- #
def _reference(x, adj_norm, w_fcn, b_fcn, w_gcn, times):
    xt = x @ w_fcn + b_fcn
    h = xt
    for _ in range(times):
        h = adj_norm @ h
    h = jnp.maximum(h @ w_gcn, 0.0)
    norm = jnp.sqrt(jnp.sum(h * h, axis=1, keepdims=True))
    emb = h / jnp.maximum(norm, 1e-12)
    a_pred = jax.nn.sigmoid(emb @ emb.T)
    return a_pred, emb, xt


def _make_inputs(key, n, input_dim, linear_dim, embedding_dim):
    k_x, k_a, k_wf, k_bf, k_wg = jax.random.split(key, 5)
    x = jax.random.normal(k_x, (n, input_dim), dtype=jnp.float32)
    # Symmetric normalized adjacency with self-loops: D^-1/2 (A+I) D^-1/2.
    a_raw = (jax.random.uniform(k_a, (n, n)) > 0.7).astype(jnp.float32)
    a_sym = jnp.maximum(a_raw, a_raw.T) + jnp.eye(n, dtype=jnp.float32)
    d_inv_sqrt = 1.0 / jnp.sqrt(jnp.sum(a_sym, axis=1))
    adj_norm = a_sym * d_inv_sqrt[:, None] * d_inv_sqrt[None, :]
    # Parameters (deterministic init, PyTorch-style uniform bounds).
    bound_f = 1.0 / jnp.sqrt(jnp.float32(input_dim))
    w_fcn = jax.random.uniform(k_wf, (input_dim, linear_dim),
                               minval=-bound_f, maxval=bound_f, dtype=jnp.float32)
    b_fcn = jax.random.uniform(k_bf, (1, linear_dim),
                               minval=-bound_f, maxval=bound_f, dtype=jnp.float32)
    bound_g = 1.0 / jnp.sqrt(jnp.float32(linear_dim))
    w_gcn = jax.random.uniform(k_wg, (linear_dim, embedding_dim),
                               minval=-bound_g, maxval=bound_g, dtype=jnp.float32)
    return x, adj_norm, w_fcn, b_fcn, w_gcn


def _check(outs, refs, atol, tag):
    names = ("A_pred", "embedding", "xt")
    for name, o, r in zip(names, outs, refs):
        assert jnp.allclose(o, r, atol=atol), f"{tag}: {name} mismatch"


if __name__ == "__main__":
    key = jax.random.PRNGKey(0)

    # --- Test 1: small graph, f32 -> fused single-kernel path ------------- #
    N, input_dim, linear_dim, embedding_dim, times = 16, 32, 32, 16, 3
    inputs = _make_inputs(key, N, input_dim, linear_dim, embedding_dim)
    outs = egae_forward(*inputs, times)
    jax.block_until_ready(outs)
    refs = _reference(*inputs, times)
    _check(outs, refs, 1e-5, "fused/f32")

    # --- Test 2: same graph with bf16 MXU inputs for smoothing ------------ #
    outs_bf16 = egae_forward(*inputs, times, compute_dtype=jnp.bfloat16)
    jax.block_until_ready(outs_bf16)
    _check(outs_bf16, refs, 5e-2, "fused/bf16")

    # --- Test 3: larger graph -> tiled path (resident h, fused epilogue) -- #
    N2, times2 = 1200, 2
    inputs2 = _make_inputs(jax.random.PRNGKey(1), N2, input_dim, linear_dim,
                           embedding_dim)
    outs2 = egae_forward(*inputs2, times2)
    jax.block_until_ready(outs2)
    refs2 = _reference(*inputs2, times2)
    _check(outs2, refs2, 2e-4, "tiled/f32")

    print("KERNEL_OK")
</pallas_src>

<mosaic_0001>
module attributes {stable_mosaic.version = 11 : i64} {
  func.func @_fused_kernel(%arg0: i32, %arg1: memref<128x128xf32, #tpu.memory_space<vmem>>, %arg2: memref<128x128xf32, #tpu.memory_space<vmem>>, %arg3: memref<128x128xf32, #tpu.memory_space<vmem>>, %arg4: memref<1x128xf32, #tpu.memory_space<vmem>>, %arg5: memref<128x128xf32, #tpu.memory_space<vmem>>, %arg6: memref<128x128xf32, #tpu.memory_space<vmem>>, %arg7: memref<128x128xf32, #tpu.memory_space<vmem>>, %arg8: memref<128x128xf32, #tpu.memory_space<vmem>>) attributes {dimension_semantics = [#tpu.dimension_semantics<arbitrary>], iteration_bounds = array<i64: 1>, scalar_prefetch = 0 : i64, scratch_operands = 0 : i64, tpu.core_type = #tpu.core_type<tc>, window_params = [{pipeline_mode = #tpu.pipeline_mode<synchronous>, transform_indices = @transform_0, window_bounds = array<i64: 128, 128>}, {pipeline_mode = #tpu.pipeline_mode<synchronous>, transform_indices = @transform_1, window_bounds = array<i64: 128, 128>}, {pipeline_mode = #tpu.pipeline_mode<synchronous>, transform_indices = @transform_2, window_bounds = array<i64: 128, 128>}, {pipeline_mode = #tpu.pipeline_mode<synchronous>, transform_indices = @transform_3, window_bounds = array<i64: 1, 128>}, {pipeline_mode = #tpu.pipeline_mode<synchronous>, transform_indices = @transform_4, window_bounds = array<i64: 128, 128>}, {pipeline_mode = #tpu.pipeline_mode<synchronous>, transform_indices = @transform_5, window_bounds = array<i64: 128, 128>}, {pipeline_mode = #tpu.pipeline_mode<synchronous>, transform_indices = @transform_6, window_bounds = array<i64: 128, 128>}, {pipeline_mode = #tpu.pipeline_mode<synchronous>, transform_indices = @transform_7, window_bounds = array<i64: 128, 128>}]} {
    %c0 = arith.constant 0 : index
    %c0_0 = arith.constant 0 : index
    %0 = vector.load %arg1[%c0, %c0_0] : memref<128x128xf32, #tpu.memory_space<vmem>>, vector<128x128xf32>
    %c0_1 = arith.constant 0 : index
    %c0_2 = arith.constant 0 : index
    %1 = vector.load %arg3[%c0_1, %c0_2] : memref<128x128xf32, #tpu.memory_space<vmem>>, vector<128x128xf32>
    %cst = arith.constant dense<0.000000e+00> : vector<128x128xf32>
    %2 = tpu.matmul %0, %1, %cst {dimension_numbers = #tpu.dot_dimension_numbers<[1], [0], [0], [1], [0, 0, 1, 1], [], []>} : vector<128x128xf32>, vector<128x128xf32>, vector<128x128xf32> -> vector<128x128xf32>
    %c0_3 = arith.constant 0 : index
    %c0_4 = arith.constant 0 : index
    %3 = vector.load %arg4[%c0_3, %c0_4] : memref<1x128xf32, #tpu.memory_space<vmem>>, vector<1x128xf32>
    %4 = vector.broadcast %3 : vector<1x128xf32> to vector<128x128xf32>
    %5 = arith.addf %2, %4 : vector<128x128xf32>
    %c0_5 = arith.constant 0 : index
    %c0_6 = arith.constant 0 : index
    %6 = vector.load %arg8[%c0_5, %c0_6] : memref<128x128xf32, #tpu.memory_space<vmem>>, vector<128x128xf32>
    tpu.vector_store %arg8[%c0_5, %c0_6], %5 {strides = array<i32>} : memref<128x128xf32, #tpu.memory_space<vmem>>, vector<128x128xf32>,
    %c0_7 = arith.constant 0 : index
    %c0_8 = arith.constant 0 : index
    %7 = vector.load %arg2[%c0_7, %c0_8] : memref<128x128xf32, #tpu.memory_space<vmem>>, vector<128x128xf32>
    %cst_9 = arith.constant dense<0.000000e+00> : vector<128x128xf32>
    %8 = tpu.matmul %7, %5, %cst_9 {dimension_numbers = #tpu.dot_dimension_numbers<[1], [0], [0], [1], [0, 0, 1, 1], [], []>} : vector<128x128xf32>, vector<128x128xf32>, vector<128x128xf32> -> vector<128x128xf32>
    %cst_10 = arith.constant dense<0.000000e+00> : vector<128x128xf32>
    %9 = tpu.matmul %7, %8, %cst_10 {dimension_numbers = #tpu.dot_dimension_numbers<[1], [0], [0], [1], [0, 0, 1, 1], [], []>} : vector<128x128xf32>, vector<128x128xf32>, vector<128x128xf32> -> vector<128x128xf32>
    %cst_11 = arith.constant dense<0.000000e+00> : vector<128x128xf32>
    %10 = tpu.matmul %7, %9, %cst_11 {dimension_numbers = #tpu.dot_dimension_numbers<[1], [0], [0], [1], [0, 0, 1, 1], [], []>} : vector<128x128xf32>, vector<128x128xf32>, vector<128x128xf32> -> vector<128x128xf32>
    %c0_12 = arith.constant 0 : index
    %c0_13 = arith.constant 0 : index
    %11 = vector.load %arg5[%c0_12, %c0_13] : memref<128x128xf32, #tpu.memory_space<vmem>>, vector<128x128xf32>
    %cst_14 = arith.constant dense<0.000000e+00> : vector<128x128xf32>
    %12 = tpu.matmul %10, %11, %cst_14 {dimension_numbers = #tpu.dot_dimension_numbers<[1], [0], [0], [1], [0, 0, 1, 1], [], []>} : vector<128x128xf32>, vector<128x128xf32>, vector<128x128xf32> -> vector<128x128xf32>
    %cst_15 = arith.constant 0.000000e+00 : f32
    %13 = vector.broadcast %cst_15 : f32 to vector<128x128xf32>
    %14 = arith.maximumf %12, %13 : vector<128x128xf32>
    %15 = arith.mulf %14, %14 : vector<128x128xf32>
    %cst_16 = arith.constant dense<0.000000e+00> : vector<128xf32>
    %16 = vector.multi_reduction <add>, %15, %cst_16 [1] : vector<128x128xf32> to vector<128xf32>
    %17 = vector.shape_cast %16 : vector<128xf32> to vector<128x1xf32>
    %cst_17 = arith.constant 1.000000e-24 : f32
    %18 = vector.broadcast %cst_17 : f32 to vector<128x1xf32>
    %19 = arith.maximumf %17, %18 : vector<128x1xf32>
    %20 = math.rsqrt %19 : vector<128x1xf32>
    %21 = vector.broadcast %20 : vector<128x1xf32> to vector<128x128xf32>
    %22 = arith.mulf %14, %21 : vector<128x128xf32>
    %c0_18 = arith.constant 0 : index
    %c0_19 = arith.constant 0 : index
    %23 = vector.load %arg7[%c0_18, %c0_19] : memref<128x128xf32, #tpu.memory_space<vmem>>, vector<128x128xf32>
    tpu.vector_store %arg7[%c0_18, %c0_19], %22 {strides = array<i32>} : memref<128x128xf32, #tpu.memory_space<vmem>>, vector<128x128xf32>,
    %cst_20 = arith.constant dense<0.000000e+00> : vector<128x128xf32>
    %24 = tpu.matmul %22, %22, %cst_20 {dimension_numbers = #tpu.dot_dimension_numbers<[1], [1], [0], [0], [0, 0, 1, 0], [], []>} : vector<128x128xf32>, vector<128x128xf32>, vector<128x128xf32> -> vector<128x128xf32>
    %25 = arith.negf %24 : vector<128x128xf32>
    %26 = math.exp %25 : vector<128x128xf32>
    %cst_21 = arith.constant 1.000000e+00 : f32
    %27 = vector.broadcast %cst_21 : f32 to vector<128x128xf32>
    %28 = arith.addf %27, %26 : vector<128x128xf32>
    %29 = arith.divf %27, %28 : vector<128x128xf32>
    %c0_22 = arith.constant 0 : index
    %c0_23 = arith.constant 0 : index
    %30 = vector.load %arg6[%c0_22, %c0_23] : memref<128x128xf32, #tpu.memory_space<vmem>>, vector<128x128xf32>
    tpu.vector_store %arg6[%c0_22, %c0_23], %29 {strides = array<i32>} : memref<128x128xf32, #tpu.memory_space<vmem>>, vector<128x128xf32>,
    return
  }
  func.func @transform_0(%arg0: i32) -> (i32, i32) {
    %c0_i32 = arith.constant 0 : i32
    %c0_i32_0 = arith.constant 0 : i32
    %c0_i32_1 = arith.constant 0 : i32
    return %c0_i32, %c0_i32_0 : i32, i32
  }
  func.func @transform_1(%arg0: i32) -> (i32, i32) {
    %c0_i32 = arith.constant 0 : i32
    %c0_i32_0 = arith.constant 0 : i32
    %c0_i32_1 = arith.constant 0 : i32
    return %c0_i32, %c0_i32_0 : i32, i32
  }
  func.func @transform_2(%arg0: i32) -> (i32, i32) {
    %c0_i32 = arith.constant 0 : i32
    %c0_i32_0 = arith.constant 0 : i32
    %c0_i32_1 = arith.constant 0 : i32
    return %c0_i32, %c0_i32_0 : i32, i32
  }
  func.func @transform_3(%arg0: i32) -> (i32, i32) {
    %c0_i32 = arith.constant 0 : i32
    %c0_i32_0 = arith.constant 0 : i32
    %c0_i32_1 = arith.constant 0 : i32
    return %c0_i32, %c0_i32_0 : i32, i32
  }
  func.func @transform_4(%arg0: i32) -> (i32, i32) {
    %c0_i32 = arith.constant 0 : i32
    %c0_i32_0 = arith.constant 0 : i32
    %c0_i32_1 = arith.constant 0 : i32
    return %c0_i32, %c0_i32_0 : i32, i32
  }
  func.func @transform_5(%arg0: i32) -> (i32, i32) {
    %c0_i32 = arith.constant 0 : i32
    %c0_i32_0 = arith.constant 0 : i32
    %c0_i32_1 = arith.constant 0 : i32
    return %c0_i32, %c0_i32_0 : i32, i32
  }
  func.func @transform_6(%arg0: i32) -> (i32, i32) {
    %c0_i32 = arith.constant 0 : i32
    %c0_i32_0 = arith.constant 0 : i32
    %c0_i32_1 = arith.constant 0 : i32
    return %c0_i32, %c0_i32_0 : i32, i32
  }
  func.func @transform_7(%arg0: i32) -> (i32, i32) {
    %c0_i32 = arith.constant 0 : i32
    %c0_i32_0 = arith.constant 0 : i32
    %c0_i32_1 = arith.constant 0 : i32
    return %c0_i32, %c0_i32_0 : i32, i32
  }
}

</mosaic_0001>

<bundles_post_ra>
// kernel: egae_forward.1
= control target key start
LH: loop header
LB: loop body
LE: loop exit
PB: predicated region body
PF: predicated region fallthrough
CT: control target
= control target key end

     0   :  { %s2652_s2 = inlined_call_operand.vmem [shape: f32[128,128], index: 2, kind: input, shape index: {}]   ;;  %s2653_s0 = inlined_call_operand.vmem [shape: f32[128,128], index: 0, kind: input, shape index: {}]   ;;  %s2654_s1 = inlined_call_operand.vmem [shape: f32[128,128], index: 1, kind: input, shape index: {}]   ;;  %s2655_s3 = inlined_call_operand.vmem [shape: f32[1,128], index: 3, kind: input, shape index: {}]   ;;  %s2656_s7 = inlined_call_operand.vmem [shape: f32[128,128], index: 7, kind: output, shape index: {2}]   ;;  %s2657_s4 = inlined_call_operand.vmem [shape: f32[128,128], index: 4, kind: input, shape index: {}]   ;;  %s2658_s6 = inlined_call_operand.vmem [shape: f32[128,128], index: 6, kind: output, shape index: {1}]   ;;  %s2659_s5 = inlined_call_operand.vmem [shape: f32[128,128], index: 5, kind: output, shape index: {0}]  }
   0x1   :  { %v39_v0 = vld [vmem:[%s2652_s2] sm:$0xff]  ;;  %v40_v1 = vld [vmem:[%s2652_s2 + $0x8] sm:$0xff]  ;;  %v41_v2 = vld [vmem:[%s2652_s2 + $0x10] sm:$0xff] }
   0x2   :  { %v1777_v3 = vpack.c.bf16 %v40_v1, %v39_v0  ;;  %v42_v4 = vld [vmem:[%s2652_s2 + $0x18] sm:$0xff]  ;;  %v43_v6 = vld [vmem:[%s2652_s2 + $0x20] sm:$0xff]  ;;  %v44_v7 = vld [vmem:[%s2652_s2 + $0x28] sm:$0xff] }
   0x3   :  { %v1781_v5 = vpack.c.bf16 %v42_v4, %v41_v2  ;;  %v1785_v8 = vpack.c.bf16 %v44_v7, %v43_v6  ;;  %v23_v9 = vld [vmem:[%s2653_s0] sm:$0xff]  ;;  %v45_v10 = vld [vmem:[%s2652_s2 + $0x30] sm:$0xff]  ;;  %v46_v11 = vld [vmem:[%s2652_s2 + $0x38] sm:$0xff] }
   0x4   :  { %1778 = vmatprep.subr.bf16.mxu0 %v1777_v3  ;;  %1473 = vmatprep.mubr.f32.mxu0 %v23_v9  ;;  %v1789_v12 = vpack.c.bf16 %v46_v11, %v45_v10  ;;  %v47_v13 = vld [vmem:[%s2652_s2 + $0x40] sm:$0xff]  ;;  %v48_v14 = vld [vmem:[%s2652_s2 + $0x48] sm:$0xff]  ;;  %v49_v16 = vld [vmem:[%s2652_s2 + $0x50] sm:$0xff] }
   0x5   :  { %1780 = vmatpush3.bf16.msra.mxu0 %v1777_v3  ;;  %v1793_v15 = vpack.c.bf16 %v48_v14, %v47_v13  ;;  %v50_v17 = vld [vmem:[%s2652_s2 + $0x58] sm:$0xff]  ;;  %v51_v19 = vld [vmem:[%s2652_s2 + $0x60] sm:$0xff]  ;;  %v52_v20 = vld [vmem:[%s2652_s2 + $0x68] sm:$0xff] }
   0x6   :  { %1782 = vmatprep.subr.bf16.mxu0 %v1781_v5  ;;  %v1797_v18 = vpack.c.bf16 %v50_v17, %v49_v16  ;;  %v1801_v21 = vpack.c.bf16 %v52_v20, %v51_v19  ;;  %v53_v22 = vld [vmem:[%s2652_s2 + $0x70] sm:$0xff]  ;;  %v54_v23 = vld [vmem:[%s2652_s2 + $0x78] sm:$0xff]  ;;  %v24_v25 = vld [vmem:[%s2653_s0 + $0x8] sm:$0xff] }
   0x7   :  { %v1805_v24 = vpack.c.bf16 %v54_v23, %v53_v22  ;;  %v25_v26 = vld [vmem:[%s2653_s0 + $0x10] sm:$0xff]  ;;  %v26_v27 = vld [vmem:[%s2653_s0 + $0x18] sm:$0xff]  ;;  %v27_v28 = vld [vmem:[%s2653_s0 + $0x20] sm:$0xff] }
   0x8   :  { %v28_v29 = vld [vmem:[%s2653_s0 + $0x28] sm:$0xff]  ;;  %v29_v30 = vld [vmem:[%s2653_s0 + $0x30] sm:$0xff]  ;;  %v30_v31 = vld [vmem:[%s2653_s0 + $0x38] sm:$0xff] }
   0x9   :  { %1784 = vmatpush3.bf16.msra.mxu0 %v1781_v5  ;;  %v31_v32 = vld [vmem:[%s2653_s0 + $0x40] sm:$0xff]  ;;  %v32_v33 = vld [vmem:[%s2653_s0 + $0x48] sm:$0xff]  ;;  %v33_v34 = vld [vmem:[%s2653_s0 + $0x50] sm:$0xff] }
   0xa   :  { %1786 = vmatprep.subr.bf16.mxu0 %v1785_v8  ;;  %v34_v35 = vld [vmem:[%s2653_s0 + $0x58] sm:$0xff]  ;;  %v35_v36 = vld [vmem:[%s2653_s0 + $0x60] sm:$0xff]  ;;  %v36_v37 = vld [vmem:[%s2653_s0 + $0x68] sm:$0xff] }
   0xb   :  { %v37_v38 = vld [vmem:[%s2653_s0 + $0x70] sm:$0xff]  ;;  %v38_v39 = vld [vmem:[%s2653_s0 + $0x78] sm:$0xff]  ;;  %v2204_v40 = vld [vmem:[%s2654_s1] sm:$0xff] }
   0xc   :  { %1529 = vmatprep.mubr.f32.mxu1 %v2204_v40  ;;  %v2211_v41 = vld [vmem:[%s2655_s3] ss:$0 sm:$0xff]  ;;  %v2285_v19 = vld [vmem:[%s2654_s1 + $0x10] sm:$0xff]  ;;  %v2292_v20 = vld [vmem:[%s2654_s1 + $0x18] sm:$0xff] }
   0xd   :  { %1788 = vmatpush3.bf16.msra.mxu0 %v1785_v8  ;;  %v2304_v22 = vld [vmem:[%s2654_s1 + $0x28] sm:$0xff]  ;;  %v2309_v23 = vld [vmem:[%s2654_s1 + $0x30] sm:$0xff] }
   0xe   :  { %1790 = vmatprep.subr.bf16.mxu0 %v1789_v12 }
  0x11   :  { %1792 = vmatpush3.bf16.msra.mxu0 %v1789_v12 }
  0x12   :  { %1794 = vmatprep.subr.bf16.mxu0 %v1793_v15 }
  0x15   :  { %1796 = vmatpush3.bf16.msra.mxu0 %v1793_v15 }
  0x16   :  { %1798 = vmatprep.subr.bf16.mxu0 %v1797_v18 }
  0x19   :  { %1800 = vmatpush3.bf16.msra.mxu0 %v1797_v18  ;;  %v2280_v18 = vld [vmem:[%s2654_s1 + $0x8] sm:$0xff] }
  0x1a   :  { %1802 = vmatprep.subr.bf16.mxu0 %v1801_v21 }
  0x1d   :  { %1804 = vmatpush3.bf16.msra.mxu0 %v1801_v21  ;;  %v2297_v21 = vld [vmem:[%s2654_s1 + $0x20] sm:$0xff] }
  0x1e   :  { %1806 = vmatprep.subr.bf16.mxu0 %v1805_v24 }
  0x21   :  { %1808 = vmatpush3.bf16.msra.mxu0 %v1805_v24  ;;  %v2316_v24 = vld [vmem:[%s2654_s1 + $0x38] sm:$0xff] }
  0x24   :  { %1474 = vmatmul.mubr.f32.vlgmr.msra.gmra.mrb[0].mxu0 %v24_v25  ;;  %v2321_v25 = vld [vmem:[%s2654_s1 + $0x40] sm:$0xff] }
  0x25   :  { %1476 = vmatprep.mubr.f32.mxu0 %v25_v26  ;;  %v2328_v26 = vld [vmem:[%s2654_s1 + $0x48] sm:$0xff] }
  0x28   :  { %1477 = vmatmul.mubr.f32.gmra.mrb[2].mxu0 %v26_v27  ;;  %v2333_v27 = vld [vmem:[%s2654_s1 + $0x50] sm:$0xff] }
  0x29   :  { %1479 = vmatprep.mubr.f32.mxu0 %v27_v28  ;;  %v2340_v28 = vld [vmem:[%s2654_s1 + $0x58] sm:$0xff] }
  0x2c   :  { %1480 = vmatmul.mubr.f32.gmra.mrb[4].mxu0 %v28_v29  ;;  %v2345_v29 = vld [vmem:[%s2654_s1 + $0x60] sm:$0xff] }
  0x2d   :  { %1482 = vmatprep.mubr.f32.mxu0 %v29_v30  ;;  %v2352_v30 = vld [vmem:[%s2654_s1 + $0x68] sm:$0xff] }
  0x30   :  { %1483 = vmatmul.mubr.f32.gmra.mrb[6].mxu0 %v30_v31  ;;  %v2357_v31 = vld [vmem:[%s2654_s1 + $0x70] sm:$0xff] }
  0x31   :  { %1485 = vmatprep.mubr.f32.mxu0 %v31_v32  ;;  %v2364_v32 = vld [vmem:[%s2654_s1 + $0x78] sm:$0xff] }
  0x34   :  { %1486 = vmatmul.mubr.f32.gmra.mrb[8].mxu0 %v32_v33 }
  0x35   :  { %1488 = vmatprep.mubr.f32.mxu0 %v33_v34 }
  0x38   :  { %1489 = vmatmul.mubr.f32.gmra.mrb[10].mxu0 %v34_v35 }
  0x39   :  { %1491 = vmatprep.mubr.f32.mxu0 %v35_v36 }
  0x3c   :  { %1492 = vmatmul.mubr.f32.gmra.mrb[12].mxu0 %v36_v37 }
  0x3d   :  { %1494 = vmatprep.mubr.f32.mxu0 %v37_v38 }
  0x40   :  { %1495 = vmatmul.mubr.f32.gmra.mrb[14].mxu0 %v38_v39 }
  0x41   :  { %1585 = vmatprep.mubr.f32.mxu0 %v2204_v40 }
  0xf7   :  { %v1475_v42 = vpop.f32.mrb[0].mxu0 }
  0xf8   :  { %v134_v43 = vadd.f32 %v1475_v42, %v2211_v41  ;;  %v128_v44 = vpop.f32.mrb[1].mxu0 }
  0xf9   :  { %v129_v45 = vadd.f32 %v2211_v41, %v128_v44 }
  0xfa   :  { %208 = vst [vmem:[%s2656_s7 + $0x8] sm:$0xff] %v134_v43 }
  0xfb   :  { %207 = vst [vmem:[%s2656_s7] sm:$0xff] %v129_v45  ;;  %v1478_v46 = vpop.f32.mrb[2].mxu0  ;;  %v1809_v47 = vpack.c.bf16 %v134_v43, %v129_v45 }
  0xfc   :  { %v144_v48 = vadd.f32 %v1478_v46, %v2211_v41  ;;  %v138_v49 = vpop.f32.mrb[3].mxu0 }
  0xfd   :  { %v139_v50 = vadd.f32 %v2211_v41, %v138_v49  ;;  %1810 = vmatprep.subr.bf16.mxu1 %v1809_v47 }
  0xfe   :  { %210 = vst [vmem:[%s2656_s7 + $0x18] sm:$0xff] %v144_v48  ;;  %1812 = vmatpush3.bf16.msra.mxu1 %v1809_v47 }
  0xff   :  { %209 = vst [vmem:[%s2656_s7 + $0x10] sm:$0xff] %v139_v50  ;;  %v1813_v51 = vpack.c.bf16 %v144_v48, %v139_v50  ;;  %v1481_v52 = vpop.f32.mrb[4].mxu0 }
 0x100   :  { %v154_v53 = vadd.f32 %v1481_v52, %v2211_v41  ;;  %v148_v54 = vpop.f32.mrb[5].mxu0 }
 0x101   :  { %v149_v55 = vadd.f32 %v2211_v41, %v148_v54  ;;  %1814 = vmatprep.subr.bf16.mxu1 %v1813_v51 }
 0x102   :  { %212 = vst [vmem:[%s2656_s7 + $0x28] sm:$0xff] %v154_v53  ;;  %1816 = vmatpush3.bf16.msra.mxu1 %v1813_v51 }
 0x103   :  { %211 = vst [vmem:[%s2656_s7 + $0x20] sm:$0xff] %v149_v55  ;;  %v1817_v56 = vpack.c.bf16 %v154_v53, %v149_v55  ;;  %v1484_v57 = vpop.f32.mrb[6].mxu0 }
 0x104   :  { %v164_v58 = vadd.f32 %v1484_v57, %v2211_v41  ;;  %v158_v59 = vpop.f32.mrb[7].mxu0  ;;  %v674_v57 = vld [vmem:[%s2657_s4] sm:$0xff] }
 0x105   :  { %v159_v60 = vadd.f32 %v2211_v41, %v158_v59  ;;  %1818 = vmatprep.subr.bf16.mxu1 %v1817_v56  ;;  %v676_v59 = vld [vmem:[%s2657_s4 + $0x10] sm:$0xff] }
 0x106   :  { %214 = vst [vmem:[%s2656_s7 + $0x38] sm:$0xff] %v164_v58  ;;  %1820 = vmatpush3.bf16.msra.mxu1 %v1817_v56 }
 0x107   :  { %213 = vst [vmem:[%s2656_s7 + $0x30] sm:$0xff] %v159_v60  ;;  %v1821_v61 = vpack.c.bf16 %v164_v58, %v159_v60  ;;  %v1487_v62 = vpop.f32.mrb[8].mxu0  ;;  %v675_v58 = vld [vmem:[%s2657_s4 + $0x8] sm:$0xff] }
 0x108   :  { %v174_v63 = vadd.f32 %v1487_v62, %v2211_v41  ;;  %v168_v0 = vpop.f32.mrb[9].mxu0  ;;  %v1905_v60 = vpack.c.bf16 %v675_v58, %v674_v57 }
 0x109   :  { %v169_v1 = vadd.f32 %v2211_v41, %v168_v0  ;;  %1822 = vmatprep.subr.bf16.mxu1 %v1821_v61  ;;  %v679_v0 = vld [vmem:[%s2657_s4 + $0x28] sm:$0xff] }
 0x10a   :  { %216 = vst [vmem:[%s2656_s7 + $0x48] sm:$0xff] %v174_v63  ;;  %1824 = vmatpush3.bf16.msra.mxu1 %v1821_v61  ;;  %v677_v61 = vld [vmem:[%s2657_s4 + $0x18] sm:$0xff] }
 0x10b   :  { %215 = vst [vmem:[%s2656_s7 + $0x40] sm:$0xff] %v169_v1  ;;  %v1825_v2 = vpack.c.bf16 %v174_v63, %v169_v1  ;;  %v1490_v3 = vpop.f32.mrb[10].mxu0  ;;  %v1909_v62 = vpack.c.bf16 %v677_v61, %v676_v59  ;;  %v678_v63 = vld [vmem:[%s2657_s4 + $0x20] sm:$0xff] }
 0x10c   :  { %v184_v4 = vadd.f32 %v1490_v3, %v2211_v41  ;;  %v178_v5 = vpop.f32.mrb[11].mxu0  ;;  %v1913_v1 = vpack.c.bf16 %v679_v0, %v678_v63  ;;  %v681_v3 = vld [vmem:[%s2657_s4 + $0x38] sm:$0xff] }
 0x10d   :  { %v179_v6 = vadd.f32 %v2211_v41, %v178_v5  ;;  %1826 = vmatprep.subr.bf16.mxu1 %v1825_v2  ;;  %v682_v5 = vld [vmem:[%s2657_s4 + $0x40] sm:$0xff] }
 0x10e   :  { %218 = vst [vmem:[%s2656_s7 + $0x58] sm:$0xff] %v184_v4  ;;  %1828 = vmatpush3.bf16.msra.mxu1 %v1825_v2  ;;  %v680_v2 = vld [vmem:[%s2657_s4 + $0x30] sm:$0xff] }
 0x10f   :  { %217 = vst [vmem:[%s2656_s7 + $0x50] sm:$0xff] %v179_v6  ;;  %v1829_v7 = vpack.c.bf16 %v184_v4, %v179_v6  ;;  %v1493_v8 = vpop.f32.mrb[12].mxu0  ;;  %v1917_v4 = vpack.c.bf16 %v681_v3, %v680_v2  ;;  %v683_v6 = vld [vmem:[%s2657_s4 + $0x48] sm:$0xff] }
 0x110   :  { %v194_v9 = vadd.f32 %v1493_v8, %v2211_v41  ;;  %v188_v10 = vpop.f32.mrb[13].mxu0  ;;  %v684_v8 = vld [vmem:[%s2657_s4 + $0x50] sm:$0xff] }
 0x111   :  { %v189_v11 = vadd.f32 %v2211_v41, %v188_v10  ;;  %1830 = vmatprep.subr.bf16.mxu1 %v1829_v7 }
 0x112   :  { %220 = vst [vmem:[%s2656_s7 + $0x68] sm:$0xff] %v194_v9  ;;  %1832 = vmatpush3.bf16.msra.mxu1 %v1829_v7  ;;  %v1921_v7 = vpack.c.bf16 %v683_v6, %v682_v5 }
 0x113   :  { %219 = vst [vmem:[%s2656_s7 + $0x60] sm:$0xff] %v189_v11  ;;  %v1833_v12 = vpack.c.bf16 %v194_v9, %v189_v11  ;;  %v1496_v13 = vpop.f32.mrb[14].mxu0  ;;  %v685_v9 = vld [vmem:[%s2657_s4 + $0x58] sm:$0xff]  ;;  %v686_v11 = vld [vmem:[%s2657_s4 + $0x60] sm:$0xff] }
 0x114   :  { %v204_v14 = vadd.f32 %v1496_v13, %v2211_v41  ;;  %v198_v15 = vpop.f32.mrb[15].mxu0  ;;  %v1925_v10 = vpack.c.bf16 %v685_v9, %v684_v8 }
 0x115   :  { %v199_v16 = vadd.f32 %v2211_v41, %v198_v15  ;;  %1834 = vmatprep.subr.bf16.mxu1 %v1833_v12  ;;  %v689_v15 = vld [vmem:[%s2657_s4 + $0x78] sm:$0xff] }
 0x116   :  { %222 = vst [vmem:[%s2656_s7 + $0x78] sm:$0xff] %v204_v14  ;;  %1836 = vmatpush3.bf16.msra.mxu1 %v1833_v12  ;;  %v687_v12 = vld [vmem:[%s2657_s4 + $0x68] sm:$0xff] }
 0x117   :  { %221 = vst [vmem:[%s2656_s7 + $0x70] sm:$0xff] %v199_v16  ;;  %v1837_v17 = vpack.c.bf16 %v204_v14, %v199_v16  ;;  %v1929_v13 = vpack.c.bf16 %v687_v12, %v686_v11  ;;  %v688_v14 = vld [vmem:[%s2657_s4 + $0x70] sm:$0xff] }
 0x118   :  { %v1933_v16 = vpack.c.bf16 %v689_v15, %v688_v14 }
 0x119   :  { %1838 = vmatprep.subr.bf16.mxu1 %v1837_v17 }
 0x11a   :  { %1840 = vmatpush3.bf16.msra.mxu1 %v1837_v17 }
 0x11d   :  { %1530 = vmatmul.mubr.f32.vlgmr.msra.gmra.mrb[0].mxu1 %v2280_v18 }
 0x11e   :  { %1532 = vmatprep.mubr.f32.mxu1 %v2285_v19 }
 0x121   :  { %1533 = vmatmul.mubr.f32.gmra.mrb[2].mxu1 %v2292_v20 }
 0x122   :  { %1535 = vmatprep.mubr.f32.mxu1 %v2297_v21 }
 0x125   :  { %1536 = vmatmul.mubr.f32.gmra.mrb[4].mxu1 %v2304_v22 }
 0x126   :  { %1538 = vmatprep.mubr.f32.mxu1 %v2309_v23 }
 0x129   :  { %1539 = vmatmul.mubr.f32.gmra.mrb[6].mxu1 %v2316_v24 }
 0x12a   :  { %1541 = vmatprep.mubr.f32.mxu1 %v2321_v25 }
 0x12d   :  { %1542 = vmatmul.mubr.f32.gmra.mrb[8].mxu1 %v2328_v26 }
 0x12e   :  { %1544 = vmatprep.mubr.f32.mxu1 %v2333_v27 }
 0x131   :  { %1545 = vmatmul.mubr.f32.gmra.mrb[10].mxu1 %v2340_v28 }
 0x132   :  { %1547 = vmatprep.mubr.f32.mxu1 %v2345_v29 }
 0x135   :  { %1548 = vmatmul.mubr.f32.gmra.mrb[12].mxu1 %v2352_v30 }
 0x136   :  { %1550 = vmatprep.mubr.f32.mxu1 %v2357_v31 }
 0x139   :  { %1551 = vmatmul.mubr.f32.gmra.mrb[14].mxu1 %v2364_v32 }
 0x13a   :  { %1641 = vmatprep.mubr.f32.mxu1 %v2204_v40 }
 0x1f0   :  { %v1531_v33 = vpop.f32.mrb[0].mxu1 }
 0x1f1   :  { %v305_v34 = vpop.f32.mrb[1].mxu1 }
 0x1f2   :  { %v1841_v35 = vpack.c.bf16 %v1531_v33, %v305_v34 }
 0x1f4   :  { %v1534_v36 = vpop.f32.mrb[2].mxu1  ;;  %1842 = vmatprep.subr.bf16.mxu0 %v1841_v35 }
 0x1f5   :  { %v315_v37 = vpop.f32.mrb[3].mxu1  ;;  %1844 = vmatpush3.bf16.msra.mxu0 %v1841_v35 }
 0x1f6   :  { %v1845_v38 = vpack.c.bf16 %v1534_v36, %v315_v37 }
 0x1f8   :  { %v1537_v39 = vpop.f32.mrb[4].mxu1  ;;  %1846 = vmatprep.subr.bf16.mxu0 %v1845_v38 }
 0x1f9   :  { %v325_v41 = vpop.f32.mrb[5].mxu1  ;;  %1848 = vmatpush3.bf16.msra.mxu0 %v1845_v38 }
 0x1fa   :  { %v1849_v42 = vpack.c.bf16 %v1537_v39, %v325_v41 }
 0x1fc   :  { %v1540_v43 = vpop.f32.mrb[6].mxu1  ;;  %1850 = vmatprep.subr.bf16.mxu0 %v1849_v42 }
 0x1fd   :  { %v335_v44 = vpop.f32.mrb[7].mxu1  ;;  %1852 = vmatpush3.bf16.msra.mxu0 %v1849_v42 }
 0x1fe   :  { %v1853_v45 = vpack.c.bf16 %v1540_v43, %v335_v44 }
 0x200   :  { %v1543_v46 = vpop.f32.mrb[8].mxu1  ;;  %1854 = vmatprep.subr.bf16.mxu0 %v1853_v45 }
 0x201   :  { %v345_v40 = vpop.f32.mrb[9].mxu1  ;;  %1856 = vmatpush3.bf16.msra.mxu0 %v1853_v45 }
 0x202   :  { %v1857_v47 = vpack.c.bf16 %v1543_v46, %v345_v40 }
 0x204   :  { %v1546_v48 = vpop.f32.mrb[10].mxu1  ;;  %1858 = vmatprep.subr.bf16.mxu0 %v1857_v47 }
 0x205   :  { %v355_v49 = vpop.f32.mrb[11].mxu1  ;;  %1860 = vmatpush3.bf16.msra.mxu0 %v1857_v47 }
 0x206   :  { %v1861_v50 = vpack.c.bf16 %v1546_v48, %v355_v49 }
 0x208   :  { %v1549_v51 = vpop.f32.mrb[12].mxu1  ;;  %1862 = vmatprep.subr.bf16.mxu0 %v1861_v50 }
 0x209   :  { %v365_v52 = vpop.f32.mrb[13].mxu1  ;;  %1864 = vmatpush3.bf16.msra.mxu0 %v1861_v50 }
 0x20a   :  { %v1865_v53 = vpack.c.bf16 %v1549_v51, %v365_v52 }
 0x20c   :  { %v1552_v54 = vpop.f32.mrb[14].mxu1  ;;  %1866 = vmatprep.subr.bf16.mxu0 %v1865_v53 }
 0x20d   :  { %v375_v55 = vpop.f32.mrb[15].mxu1  ;;  %1868 = vmatpush3.bf16.msra.mxu0 %v1865_v53 }
 0x20e   :  { %v1869_v56 = vpack.c.bf16 %v1552_v54, %v375_v55 }
 0x210   :  { %1870 = vmatprep.subr.bf16.mxu0 %v1869_v56 }
 0x211   :  { %1872 = vmatpush3.bf16.msra.mxu0 %v1869_v56 }
 0x212   :  { %1906 = vmatprep.subr.bf16.mxu0 %v1905_v60 }
 0x214   :  { %1586 = vmatmul.mubr.f32.vlgmr.msra.gmra.mrb[16].mxu0 %v2280_v18 }
 0x215   :  { %1588 = vmatprep.mubr.f32.mxu0 %v2285_v19  ;;  %1908 = vmatpush3.bf16.msra.mxu0 %v1905_v60 }
 0x216   :  { %1910 = vmatprep.subr.bf16.mxu0 %v1909_v62 }
 0x218   :  { %1589 = vmatmul.mubr.f32.gmra.mrb[18].mxu0 %v2292_v20 }
 0x219   :  { %1591 = vmatprep.mubr.f32.mxu0 %v2297_v21  ;;  %1912 = vmatpush3.bf16.msra.mxu0 %v1909_v62 }
 0x21a   :  { %1914 = vmatprep.subr.bf16.mxu0 %v1913_v1 }
 0x21c   :  { %1592 = vmatmul.mubr.f32.gmra.mrb[20].mxu0 %v2304_v22 }
 0x21d   :  { %1594 = vmatprep.mubr.f32.mxu0 %v2309_v23  ;;  %1916 = vmatpush3.bf16.msra.mxu0 %v1913_v1 }
 0x21e   :  { %1918 = vmatprep.subr.bf16.mxu0 %v1917_v4 }
 0x220   :  { %1595 = vmatmul.mubr.f32.gmra.mrb[22].mxu0 %v2316_v24 }
 0x221   :  { %1597 = vmatprep.mubr.f32.mxu0 %v2321_v25  ;;  %1920 = vmatpush3.bf16.msra.mxu0 %v1917_v4 }
 0x222   :  { %1922 = vmatprep.subr.bf16.mxu0 %v1921_v7 }
 0x224   :  { %1598 = vmatmul.mubr.f32.gmra.mrb[24].mxu0 %v2328_v26 }
 0x225   :  { %1600 = vmatprep.mubr.f32.mxu0 %v2333_v27  ;;  %1924 = vmatpush3.bf16.msra.mxu0 %v1921_v7 }
 0x226   :  { %1926 = vmatprep.subr.bf16.mxu0 %v1925_v10 }
 0x228   :  { %1601 = vmatmul.mubr.f32.gmra.mrb[26].mxu0 %v2340_v28 }
 0x229   :  { %1603 = vmatprep.mubr.f32.mxu0 %v2345_v29  ;;  %1928 = vmatpush3.bf16.msra.mxu0 %v1925_v10 }
 0x22a   :  { %1930 = vmatprep.subr.bf16.mxu0 %v1929_v13 }
 0x22c   :  { %1604 = vmatmul.mubr.f32.gmra.mrb[28].mxu0 %v2352_v30 }
 0x22d   :  { %1606 = vmatprep.mubr.f32.mxu0 %v2357_v31  ;;  %1932 = vmatpush3.bf16.msra.mxu0 %v1929_v13 }
 0x22e   :  { %1934 = vmatprep.subr.bf16.mxu0 %v1933_v16 }
 0x230   :  { %1607 = vmatmul.mubr.f32.gmra.mrb[30].mxu0 %v2364_v32 }
 0x231   :  { %1936 = vmatpush3.bf16.msra.mxu0 %v1933_v16 }
 0x2e7   :  { %v1587_v17 = vpop.f32.mrb[16].mxu0 }
 0x2e8   :  { %v450_v33 = vpop.f32.mrb[17].mxu0 }
 0x2e9   :  { %v1873_v34 = vpack.c.bf16 %v1587_v17, %v450_v33 }
 0x2eb   :  { %v1590_v35 = vpop.f32.mrb[18].mxu0  ;;  %1874 = vmatprep.subr.bf16.mxu1 %v1873_v34 }
 0x2ec   :  { %v460_v36 = vpop.f32.mrb[19].mxu0  ;;  %1876 = vmatpush3.bf16.msra.mxu1 %v1873_v34 }
 0x2ed   :  { %v1877_v37 = vpack.c.bf16 %v1590_v35, %v460_v36 }
 0x2ef   :  { %v1593_v38 = vpop.f32.mrb[20].mxu0  ;;  %1878 = vmatprep.subr.bf16.mxu1 %v1877_v37 }
 0x2f0   :  { %v470_v39 = vpop.f32.mrb[21].mxu0  ;;  %1880 = vmatpush3.bf16.msra.mxu1 %v1877_v37 }
 0x2f1   :  { %v1881_v41 = vpack.c.bf16 %v1593_v38, %v470_v39 }
 0x2f3   :  { %v1596_v42 = vpop.f32.mrb[22].mxu0  ;;  %1882 = vmatprep.subr.bf16.mxu1 %v1881_v41 }
 0x2f4   :  { %v480_v43 = vpop.f32.mrb[23].mxu0  ;;  %1884 = vmatpush3.bf16.msra.mxu1 %v1881_v41 }
 0x2f5   :  { %v1885_v44 = vpack.c.bf16 %v1596_v42, %v480_v43 }
 0x2f7   :  { %v1599_v45 = vpop.f32.mrb[24].mxu0  ;;  %1886 = vmatprep.subr.bf16.mxu1 %v1885_v44 }
 0x2f8   :  { %v490_v46 = vpop.f32.mrb[25].mxu0  ;;  %1888 = vmatpush3.bf16.msra.mxu1 %v1885_v44 }
 0x2f9   :  { %v1889_v40 = vpack.c.bf16 %v1599_v45, %v490_v46 }
 0x2fb   :  { %v1602_v47 = vpop.f32.mrb[26].mxu0  ;;  %1890 = vmatprep.subr.bf16.mxu1 %v1889_v40 }
 0x2fc   :  { %v500_v48 = vpop.f32.mrb[27].mxu0  ;;  %1892 = vmatpush3.bf16.msra.mxu1 %v1889_v40 }
 0x2fd   :  { %v1893_v49 = vpack.c.bf16 %v1602_v47, %v500_v48 }
 0x2ff   :  { %v1605_v50 = vpop.f32.mrb[28].mxu0  ;;  %1894 = vmatprep.subr.bf16.mxu1 %v1893_v49 }
 0x300   :  { %v510_v51 = vpop.f32.mrb[29].mxu0  ;;  %1896 = vmatpush3.bf16.msra.mxu1 %v1893_v49 }
 0x301   :  { %v1897_v52 = vpack.c.bf16 %v1605_v50, %v510_v51 }
 0x303   :  { %v1608_v53 = vpop.f32.mrb[30].mxu0  ;;  %1898 = vmatprep.subr.bf16.mxu1 %v1897_v52 }
 0x304   :  { %v520_v54 = vpop.f32.mrb[31].mxu0  ;;  %1900 = vmatpush3.bf16.msra.mxu1 %v1897_v52 }
 0x305   :  { %v1901_v55 = vpack.c.bf16 %v1608_v53, %v520_v54 }
 0x307   :  { %1902 = vmatprep.subr.bf16.mxu1 %v1901_v55 }
 0x308   :  { %1904 = vmatpush3.bf16.msra.mxu1 %v1901_v55 }
 0x30b   :  { %1642 = vmatmul.mubr.f32.vlgmr.msra.gmra.mrb[16].mxu1 %v2280_v18 }
 0x30c   :  { %1644 = vmatprep.mubr.f32.mxu1 %v2285_v19 }
 0x30f   :  { %1645 = vmatmul.mubr.f32.gmra.mrb[18].mxu1 %v2292_v20 }
 0x310   :  { %1647 = vmatprep.mubr.f32.mxu1 %v2297_v21 }
 0x313   :  { %1648 = vmatmul.mubr.f32.gmra.mrb[20].mxu1 %v2304_v22 }
 0x314   :  { %1650 = vmatprep.mubr.f32.mxu1 %v2309_v23 }
 0x317   :  { %1651 = vmatmul.mubr.f32.gmra.mrb[22].mxu1 %v2316_v24 }
 0x318   :  { %1653 = vmatprep.mubr.f32.mxu1 %v2321_v25 }
 0x31b   :  { %1654 = vmatmul.mubr.f32.gmra.mrb[24].mxu1 %v2328_v26 }
 0x31c   :  { %1656 = vmatprep.mubr.f32.mxu1 %v2333_v27 }
 0x31f   :  { %1657 = vmatmul.mubr.f32.gmra.mrb[26].mxu1 %v2340_v28 }
 0x320   :  { %1659 = vmatprep.mubr.f32.mxu1 %v2345_v29 }
 0x323   :  { %1660 = vmatmul.mubr.f32.gmra.mrb[28].mxu1 %v2352_v30 }
 0x324   :  { %1662 = vmatprep.mubr.f32.mxu1 %v2357_v31 }
 0x327   :  { %1663 = vmatmul.mubr.f32.gmra.mrb[30].mxu1 %v2364_v32 }
 0x3de   :  { %v1643_v18 = vpop.f32.mrb[16].mxu1 }
 0x3df   :  { %v595_v19 = vpop.f32.mrb[17].mxu1 }
 0x3e0   :  { %1697 = vmatprep.mubr.f32.mxu0 %v595_v19 }
 0x3e1   :  { %1698 = vmatmul.mubr.f32.vlgmr.msra.gmra.mrb[32].mxu0 %v1643_v18 }
 0x3e2   :  { %v1646_v20 = vpop.f32.mrb[18].mxu1 }
 0x3e3   :  { %v605_v21 = vpop.f32.mrb[19].mxu1 }
 0x3e4   :  { %1700 = vmatprep.mubr.f32.mxu0 %v605_v21 }
 0x3e5   :  { %1701 = vmatmul.mubr.f32.gmra.mrb[34].mxu0 %v1646_v20 }
 0x3e6   :  { %v1649_v22 = vpop.f32.mrb[20].mxu1 }
 0x3e7   :  { %v615_v23 = vpop.f32.mrb[21].mxu1 }
 0x3e8   :  { %1703 = vmatprep.mubr.f32.mxu0 %v615_v23 }
 0x3e9   :  { %1704 = vmatmul.mubr.f32.gmra.mrb[36].mxu0 %v1649_v22 }
 0x3ea   :  { %v1652_v24 = vpop.f32.mrb[22].mxu1 }
 0x3eb   :  { %v625_v25 = vpop.f32.mrb[23].mxu1 }
 0x3ec   :  { %1706 = vmatprep.mubr.f32.mxu0 %v625_v25 }
 0x3ed   :  { %1707 = vmatmul.mubr.f32.gmra.mrb[38].mxu0 %v1652_v24 }
 0x3ee   :  { %v1655_v26 = vpop.f32.mrb[24].mxu1 }
 0x3ef   :  { %v635_v27 = vpop.f32.mrb[25].mxu1 }
 0x3f0   :  { %1709 = vmatprep.mubr.f32.mxu0 %v635_v27 }
 0x3f1   :  { %1710 = vmatmul.mubr.f32.gmra.mrb[40].mxu0 %v1655_v26 }
 0x3f2   :  { %v1658_v28 = vpop.f32.mrb[26].mxu1 }
 0x3f3   :  { %v645_v29 = vpop.f32.mrb[27].mxu1 }
 0x3f4   :  { %1712 = vmatprep.mubr.f32.mxu0 %v645_v29 }
 0x3f5   :  { %1713 = vmatmul.mubr.f32.gmra.mrb[42].mxu0 %v1658_v28 }
 0x3f6   :  { %v1661_v30 = vpop.f32.mrb[28].mxu1 }
 0x3f7   :  { %v655_v31 = vpop.f32.mrb[29].mxu1 }
 0x3f8   :  { %1715 = vmatprep.mubr.f32.mxu0 %v655_v31 }
 0x3f9   :  { %1716 = vmatmul.mubr.f32.gmra.mrb[44].mxu0 %v1661_v30 }
 0x3fa   :  { %v1664_v32 = vpop.f32.mrb[30].mxu1 }
 0x3fb   :  { %v665_v56 = vpop.f32.mrb[31].mxu1 }
 0x3fc   :  { %1718 = vmatprep.mubr.f32.mxu0 %v665_v56 }
 0x3fd   :  { %1719 = vmatmul.mubr.f32.gmra.mrb[46].mxu0 %v1664_v32 }
 0x4b4   :  { %v1699_v57 = vpop.f32.mrb[32].mxu0 }
 0x4b5   :  { %v756_v58 = vpop.f32.mrb[33].mxu0  ;;  %v2448_v60 = vmax.f32 %v1699_v57, 0.0 }
 0x4b6   :  { %v2446_v59 = vmax.f32 %v756_v58, 0.0 }
 0x4b7   :  { %v852_v3 = vmul.f32 %v2448_v60, %v2448_v60 }
 0x4b8   :  { %v1702_v61 = vpop.f32.mrb[34].mxu0  ;;  %v851_v62 = vmul.f32 %v2446_v59, %v2446_v59 }
 0x4b9   :  { %v766_v63 = vpop.f32.mrb[35].mxu0  ;;  %v2454_v1 = vmax.f32 %v1702_v61, 0.0 }
 0x4ba   :  { %v2452_v0 = vmax.f32 %v766_v63, 0.0  ;;  %867 = vadd.xlane.f32.xlu0 %v851_v62 }
 0x4bb   :  { %v854_v9 = vmul.f32 %v2454_v1, %v2454_v1 }
 0x4bc   :  { %v1705_v2 = vpop.f32.mrb[36].mxu0  ;;  %v853_v4 = vmul.f32 %v2452_v0, %v2452_v0 }
 0x4bd   :  { %v776_v5 = vpop.f32.mrb[37].mxu0  ;;  %v2460_v6 = vmax.f32 %v1705_v2, 0.0 }
 0x4be   :  { %v2462_v7 = vmax.f32 %v776_v5, 0.0  ;;  %869 = vadd.xlane.f32.xlu0 %v852_v3  ;;  %871 = vadd.xlane.f32.xlu1 %v853_v4 }
 0x4bf   :  { %v856_v14 = vmul.f32 %v2460_v6, %v2460_v6 }
 0x4c0   :  { %v1708_v8 = vpop.f32.mrb[38].mxu0  ;;  %v855_v10 = vmul.f32 %v2462_v7, %v2462_v7 }
 0x4c1   :  { %v786_v11 = vpop.f32.mrb[39].mxu0  ;;  %v2468_v12 = vmax.f32 %v1708_v8, 0.0 }
 0x4c2   :  { %v2470_v13 = vmax.f32 %v786_v11, 0.0  ;;  %873 = vadd.xlane.f32.xlu1 %v854_v9  ;;  %875 = vadd.xlane.f32.xlu0 %v855_v10 }
 0x4c3   :  { %v858_v35 = vmul.f32 %v2468_v12, %v2468_v12 }
 0x4c4   :  { %v1711_v15 = vpop.f32.mrb[40].mxu0  ;;  %v857_v16 = vmul.f32 %v2470_v13, %v2470_v13 }
 0x4c5   :  { %v796_v17 = vpop.f32.mrb[41].mxu0  ;;  %v2476_v33 = vmax.f32 %v1711_v15, 0.0 }
 0x4c6   :  { %v2478_v34 = vmax.f32 %v796_v17, 0.0  ;;  %877 = vadd.xlane.f32.xlu1 %v856_v14  ;;  %879 = vadd.xlane.f32.xlu0 %v857_v16 }
 0x4c7   :  { %v860_v42 = vmul.f32 %v2476_v33, %v2476_v33 }
 0x4c8   :  { %v1714_v36 = vpop.f32.mrb[42].mxu0  ;;  %v859_v37 = vmul.f32 %v2478_v34, %v2478_v34 }
 0x4c9   :  { %v806_v38 = vpop.f32.mrb[43].mxu0  ;;  %v2484_v39 = vmax.f32 %v1714_v36, 0.0 }
 0x4ca   :  { %v2486_v41 = vmax.f32 %v806_v38, 0.0  ;;  %881 = vadd.xlane.f32.xlu1 %v858_v35  ;;  %883 = vadd.xlane.f32.xlu0 %v859_v37 }
 0x4cb   :  { %v862_v47 = vmul.f32 %v2484_v39, %v2484_v39 }
 0x4cc   :  { %v1717_v43 = vpop.f32.mrb[44].mxu0  ;;  %v861_v44 = vmul.f32 %v2486_v41, %v2486_v41 }
 0x4cd   :  { %v816_v45 = vpop.f32.mrb[45].mxu0  ;;  %v2492_v46 = vmax.f32 %v1717_v43, 0.0 }
 0x4ce   :  { %v2494_v40 = vmax.f32 %v816_v45, 0.0  ;;  %885 = vadd.xlane.f32.xlu1 %v860_v42  ;;  %887 = vadd.xlane.f32.xlu0 %v861_v44 }
 0x4cf   :  { %v864_v53 = vmul.f32 %v2492_v46, %v2492_v46 }
 0x4d0   :  { %v1720_v48 = vpop.f32.mrb[46].mxu0  ;;  %v863_v49 = vmul.f32 %v2494_v40, %v2494_v40 }
 0x4d1   :  { %v826_v50 = vpop.f32.mrb[47].mxu0  ;;  %v2500_v51 = vmax.f32 %v1720_v48, 0.0 }
 0x4d2   :  { %v2502_v52 = vmax.f32 %v826_v50, 0.0  ;;  %889 = vadd.xlane.f32.xlu1 %v862_v47  ;;  %891 = vadd.xlane.f32.xlu0 %v863_v49 }
 0x4d3   :  { %v866_v55 = vmul.f32 %v2500_v51, %v2500_v51 }
 0x4d4   :  { %v865_v54 = vmul.f32 %v2502_v52, %v2502_v52 }
 0x4d6   :  { %893 = vadd.xlane.f32.xlu1 %v864_v53  ;;  %895 = vadd.xlane.f32.xlu0 %v865_v54 }
 0x4da   :  { %897 = vadd.xlane.f32.xlu1 %v866_v55 }
 0x547   :  { %v868_v18 = vpop.xlane.xlu0 %867 }
 0x548   :  { %v899_v19 = vmax.f32 %v868_v18, 1e-24 }
 0x54a   :  { %1969 = vrsqrt.f32 %v899_v19 }
 0x54b   :  { %v870_v20 = vpop.xlane.xlu0 %869  ;;  %v872_v21 = vpop.xlane.xlu1 %871 }
 0x54c   :  { %v900_v22 = vmax.f32 %v870_v20, 1e-24  ;;  %v901_v23 = vmax.f32 %v872_v21, 1e-24 }
 0x54e   :  { %1971 = vrsqrt.f32 %v900_v22 }
 0x54f   :  { %1973 = vrsqrt.f32 %v901_v23  ;;  %v874_v24 = vpop.xlane.xlu1 %873  ;;  %v876_v25 = vpop.xlane.xlu0 %875 }
 0x550   :  { %v902_v26 = vmax.f32 %v874_v24, 1e-24  ;;  %v903_v27 = vmax.f32 %v876_v25, 1e-24 }
 0x552   :  { %1975 = vrsqrt.f32 %v902_v26 }
 0x553   :  { %1977 = vrsqrt.f32 %v903_v27  ;;  %v878_v28 = vpop.xlane.xlu1 %877  ;;  %v880_v29 = vpop.xlane.xlu0 %879 }
 0x554   :  { %v1970_v30 = vpop.eup %1969  ;;  %v904_v31 = vmax.f32 %v878_v28, 1e-24  ;;  %v905_v32 = vmax.f32 %v880_v29, 1e-24 }
 0x555   :  { %v931_v56 = vmul.f32 %v1970_v30, %v2446_v59 }
 0x556   :  { %1979 = vrsqrt.f32 %v904_v31 }
 0x557   :  { %1981 = vrsqrt.f32 %v905_v32  ;;  %947 = vst [vmem:[%s2658_s6] sm:$0xff] %v931_v56  ;;  %1753 = vmatprep.mubr.f32.mxu1 %v931_v56  ;;  %v882_v57 = vpop.xlane.xlu1 %881  ;;  %v884_v58 = vpop.xlane.xlu0 %883 }
 0x558   :  { %v1972_v61 = vpop.eup %1971  ;;  %v906_v62 = vmax.f32 %v882_v57, 1e-24  ;;  %v907_v63 = vmax.f32 %v884_v58, 1e-24 }
 0x559   :  { %v1974_v2 = vpop.eup %1973  ;;  %v2515_v3 = vmul.f32 %v1972_v61, %v2448_v60 }
 0x55a   :  { %1983 = vrsqrt.f32 %v906_v62  ;;  %v2518_v4 = vmul.f32 %v1974_v2, %v2452_v0 }
 0x55b   :  { %1985 = vrsqrt.f32 %v907_v63  ;;  %v886_v59 = vpop.xlane.xlu1 %885  ;;  %v888_v5 = vpop.xlane.xlu0 %887  ;;  %948 = vst [vmem:[%s2658_s6 + $0x8] sm:$0xff] %v2515_v3  ;;  %v1937_v8 = vpack.c.bf16 %v2515_v3, %v931_v56 }
 0x55c   :  { %v1976_v9 = vpop.eup %1975  ;;  %v908_v10 = vmax.f32 %v886_v59, 1e-24  ;;  %v909_v11 = vmax.f32 %v888_v5, 1e-24  ;;  %949 = vst [vmem:[%s2658_s6 + $0x10] sm:$0xff] %v2518_v4 }
 0x55d   :  { %v1978_v60 = vpop.eup %1977  ;;  %1938 = vmatprep.subr.bf16.mxu1 %v1937_v8  ;;  %v2530_v0 = vmul.f32 %v1976_v9, %v2454_v1 }
 0x55e   :  { %1987 = vrsqrt.f32 %v908_v10  ;;  %1940 = vmatpush3.bf16.xpose.msra.mxu1 %v1937_v8  ;;  %v2533_v14 = vmul.f32 %v1978_v60, %v2462_v7 }
 0x55f   :  { %1989 = vrsqrt.f32 %v909_v11  ;;  %v890_v15 = vpop.xlane.xlu1 %889  ;;  %v892_v16 = vpop.xlane.xlu0 %891  ;;  %950 = vst [vmem:[%s2658_s6 + $0x18] sm:$0xff] %v2530_v0  ;;  %v1941_v17 = vpack.c.bf16 %v2530_v0, %v2518_v4 }
 0x560   :  { %v1980_v35 = vpop.eup %1979  ;;  %v910_v36 = vmax.f32 %v890_v15, 1e-24  ;;  %v911_v1 = vmax.f32 %v892_v16, 1e-24  ;;  %951 = vst [vmem:[%s2658_s6 + $0x20] sm:$0xff] %v2533_v14 }
 0x561   :  { %v1982_v7 = vpop.eup %1981  ;;  %1942 = vmatprep.subr.bf16.mxu1 %v1941_v17  ;;  %v2546_v37 = vmul.f32 %v1980_v35, %v2460_v6 }
 0x562   :  { %1991 = vrsqrt.f32 %v910_v36  ;;  %v2549_v38 = vmul.f32 %v1982_v7, %v2470_v13 }
 0x563   :  { %1993 = vrsqrt.f32 %v911_v1  ;;  %v894_v42 = vpop.xlane.xlu1 %893  ;;  %v896_v43 = vpop.xlane.xlu0 %895  ;;  %952 = vst [vmem:[%s2658_s6 + $0x28] sm:$0xff] %v2546_v37  ;;  %v1945_v13 = vpack.c.bf16 %v2546_v37, %v2533_v14 }
 0x564   :  { %v1984_v44 = vpop.eup %1983  ;;  %v912_v45 = vmax.f32 %v894_v42, 1e-24  ;;  %v913_v47 = vmax.f32 %v896_v43, 1e-24  ;;  %953 = vst [vmem:[%s2658_s6 + $0x30] sm:$0xff] %v2549_v38 }
 0x565   :  { %v1986_v6 = vpop.eup %1985  ;;  %v938_v48 = vmul.f32 %v1984_v44, %v2468_v12 }
 0x566   :  { %1995 = vrsqrt.f32 %v912_v45  ;;  %1944 = vmatpush3.bf16.xpose.msra.mxu1 %v1941_v17  ;;  %v939_v49 = vmul.f32 %v1986_v6, %v2478_v34 }
 0x567   :  { %1997 = vrsqrt.f32 %v913_v47  ;;  %1946 = vmatprep.subr.bf16.mxu1 %v1945_v13  ;;  %v898_v50 = vpop.xlane.xlu1 %897  ;;  %954 = vst [vmem:[%s2658_s6 + $0x38] sm:$0xff] %v938_v48  ;;  %v1949_v20 = vpack.c.bf16 %v938_v48, %v2549_v38 }
 0x568   :  { %v1988_v53 = vpop.eup %1987  ;;  %v914_v54 = vmax.f32 %v898_v50, 1e-24  ;;  %955 = vst [vmem:[%s2658_s6 + $0x40] sm:$0xff] %v939_v49 }
 0x569   :  { %v1990_v55 = vpop.eup %1989  ;;  %v940_v12 = vmul.f32 %v1988_v53, %v2476_v33 }
 0x56a   :  { %1999 = vrsqrt.f32 %v914_v54  ;;  %v941_v18 = vmul.f32 %v1990_v55, %v2486_v41 }
 0x56b   :  { %956 = vst [vmem:[%s2658_s6 + $0x48] sm:$0xff] %v940_v12 }
 0x56c   :  { %v1992_v34 = vpop.eup %1991  ;;  %957 = vst [vmem:[%s2658_s6 + $0x50] sm:$0xff] %v941_v18 }
 0x56d   :  { %v1994_v19 = vpop.eup %1993  ;;  %v942_v21 = vmul.f32 %v1992_v34, %v2484_v39 }
 0x56e   :  { %1948 = vmatpush3.bf16.xpose.msra.mxu1 %v1945_v13  ;;  %v943_v33 = vmul.f32 %v1994_v19, %v2494_v40  ;;  %v1953_v40 = vpack.c.bf16 %v940_v12, %v939_v49 }
 0x56f   :  { %1950 = vmatprep.subr.bf16.mxu1 %v1949_v20  ;;  %958 = vst [vmem:[%s2658_s6 + $0x58] sm:$0xff] %v942_v21 }
 0x570   :  { %v1996_v41 = vpop.eup %1995  ;;  %959 = vst [vmem:[%s2658_s6 + $0x60] sm:$0xff] %v943_v33 }
 0x571   :  { %v1998_v22 = vpop.eup %1997  ;;  %v944_v23 = vmul.f32 %v1996_v41, %v2492_v46  ;;  %v1957_v46 = vpack.c.bf16 %v942_v21, %v941_v18 }
 0x572   :  { %v945_v24 = vmul.f32 %v1998_v22, %v2502_v52 }
 0x573   :  { %960 = vst [vmem:[%s2658_s6 + $0x68] sm:$0xff] %v944_v23  ;;  %v1961_v52 = vpack.c.bf16 %v944_v23, %v943_v33 }
 0x574   :  { %v2000_v39 = vpop.eup %1999  ;;  %961 = vst [vmem:[%s2658_s6 + $0x70] sm:$0xff] %v945_v24 }
 0x575   :  { %v946_v25 = vmul.f32 %v2000_v39, %v2500_v51 }
 0x576   :  { %1952 = vmatpush3.bf16.xpose.msra.mxu1 %v1949_v20 }
 0x577   :  { %1954 = vmatprep.subr.bf16.mxu1 %v1953_v40  ;;  %962 = vst [vmem:[%s2658_s6 + $0x78] sm:$0xff] %v946_v25  ;;  %v1965_v26 = vpack.c.bf16 %v946_v25, %v945_v24 }
 0x57e   :  { %1956 = vmatpush3.bf16.xpose.msra.mxu1 %v1953_v40 }
 0x57f   :  { %1958 = vmatprep.subr.bf16.mxu1 %v1957_v46 }
 0x586   :  { %1960 = vmatpush3.bf16.xpose.msra.mxu1 %v1957_v46 }
 0x587   :  { %1962 = vmatprep.subr.bf16.mxu1 %v1961_v52 }
 0x58e   :  { %1964 = vmatpush3.bf16.xpose.msra.mxu1 %v1961_v52 }
 0x58f   :  { %1966 = vmatprep.subr.bf16.mxu1 %v1965_v26 }
 0x596   :  { %1968 = vmatpush3.bf16.xpose.msra.mxu1 %v1965_v26 }
 0x59d   :  { %1754 = vmatmul.mubr.f32.vlgmr.msra.gmra.mrb[32].mxu1 %v2515_v3 }
 0x59e   :  { %1756 = vmatprep.mubr.f32.mxu1 %v2518_v4 }
 0x5a1   :  { %1757 = vmatmul.mubr.f32.gmra.mrb[34].mxu1 %v2530_v0 }
 0x5a2   :  { %1759 = vmatprep.mubr.f32.mxu1 %v2533_v14 }
 0x5a5   :  { %1760 = vmatmul.mubr.f32.gmra.mrb[36].mxu1 %v2546_v37 }
 0x5a6   :  { %1762 = vmatprep.mubr.f32.mxu1 %v2549_v38 }
 0x5a9   :  { %1763 = vmatmul.mubr.f32.gmra.mrb[38].mxu1 %v938_v48 }
 0x5aa   :  { %1765 = vmatprep.mubr.f32.mxu1 %v939_v49 }
 0x5ad   :  { %1766 = vmatmul.mubr.f32.gmra.mrb[40].mxu1 %v940_v12 }
 0x5ae   :  { %1768 = vmatprep.mubr.f32.mxu1 %v941_v18 }
 0x5b1   :  { %1769 = vmatmul.mubr.f32.gmra.mrb[42].mxu1 %v942_v21 }
 0x5b2   :  { %1771 = vmatprep.mubr.f32.mxu1 %v943_v33 }
 0x5b5   :  { %1772 = vmatmul.mubr.f32.gmra.mrb[44].mxu1 %v944_v23 }
 0x5b6   :  { %1774 = vmatprep.mubr.f32.mxu1 %v945_v24 }
 0x5b9   :  { %1775 = vmatmul.mubr.f32.gmra.mrb[46].mxu1 %v946_v25 }
 0x670   :  { %v1755_v51 = vpop.f32.mrb[32].mxu1 }
 0x671   :  { %v1234_v27 = vmul.f32 -1.442695, %v1755_v51  ;;  %v1029_v28 = vpop.f32.mrb[33].mxu1 }
 0x672   :  { %v1233_v29 = vmul.f32 -1.442695, %v1029_v28 }
 0x673   :  { %2001 = vpow2.f32 %v1234_v27 }
 0x674   :  { %2003 = vpow2.f32 %v1233_v29  ;;  %v1758_v30 = vpop.f32.mrb[34].mxu1 }
 0x675   :  { %v1236_v31 = vmul.f32 -1.442695, %v1758_v30  ;;  %v1039_v32 = vpop.f32.mrb[35].mxu1 }
 0x676   :  { %v1235_v56 = vmul.f32 -1.442695, %v1039_v32 }
 0x677   :  { %2005 = vpow2.f32 %v1236_v31 }
 0x678   :  { %2007 = vpow2.f32 %v1235_v56  ;;  %v1761_v57 = vpop.f32.mrb[36].mxu1 }
 0x679   :  { %v1238_v58 = vmul.f32 -1.442695, %v1761_v57  ;;  %v1049_v61 = vpop.f32.mrb[37].mxu1 }
 0x67a   :  { %v1237_v62 = vmul.f32 -1.442695, %v1049_v61 }
 0x67b   :  { %2009 = vpow2.f32 %v1238_v58 }
 0x67c   :  { %2011 = vpow2.f32 %v1237_v62  ;;  %v1764_v63 = vpop.f32.mrb[38].mxu1 }
 0x67d   :  { %v2002_v2 = vpop.eup %2001  ;;  %v1240_v3 = vmul.f32 -1.442695, %v1764_v63  ;;  %v1059_v4 = vpop.f32.mrb[39].mxu1 }
 0x67e   :  { %v2004_v59 = vpop.eup %2003  ;;  %v1157_v5 = vadd.f32 1.0, %v2002_v2  ;;  %v1239_v8 = vmul.f32 -1.442695, %v1059_v4 }
 0x67f   :  { %v1156_v9 = vadd.f32 1.0, %v2004_v59  ;;  %2013 = vpow2.f32 %v1240_v3 }
 0x680   :  { %2015 = vrcp.f32 %v1157_v5  ;;  %v1767_v10 = vpop.f32.mrb[40].mxu1 }
 0x681   :  { %v2006_v11 = vpop.eup %2005  ;;  %2017 = vrcp.f32 %v1156_v9  ;;  %v1242_v60 = vmul.f32 -1.442695, %v1767_v10  ;;  %v1069_v0 = vpop.f32.mrb[41].mxu1 }
 0x682   :  { %v2008_v14 = vpop.eup %2007  ;;  %v1159_v15 = vadd.f32 1.0, %v2006_v11  ;;  %2019 = vpow2.f32 %v1239_v8  ;;  %v1241_v16 = vmul.f32 -1.442695, %v1069_v0 }
 0x683   :  { %v1158_v17 = vadd.f32 1.0, %v2008_v14  ;;  %2021 = vpow2.f32 %v1242_v60 }
 0x684   :  { %2023 = vrcp.f32 %v1159_v15  ;;  %v1770_v35 = vpop.f32.mrb[42].mxu1 }
 0x685   :  { %v2010_v36 = vpop.eup %2009  ;;  %2025 = vrcp.f32 %v1158_v17  ;;  %v1244_v1 = vmul.f32 -1.442695, %v1770_v35  ;;  %v1079_v7 = vpop.f32.mrb[43].mxu1 }
 0x686   :  { %v2012_v37 = vpop.eup %2011  ;;  %v1161_v38 = vadd.f32 1.0, %v2010_v36  ;;  %2027 = vpow2.f32 %v1241_v16  ;;  %v1243_v42 = vmul.f32 -1.442695, %v1079_v7 }
 0x687   :  { %v1160_v43 = vadd.f32 1.0, %v2012_v37  ;;  %2029 = vpow2.f32 %v1244_v1 }
 0x688   :  { %2031 = vrcp.f32 %v1161_v38  ;;  %v1773_v44 = vpop.f32.mrb[44].mxu1 }
 0x689   :  { %v2014_v45 = vpop.eup %2013  ;;  %2033 = vrcp.f32 %v1160_v43  ;;  %v1246_v47 = vmul.f32 -1.442695, %v1773_v44  ;;  %v1089_v6 = vpop.f32.mrb[45].mxu1 }
 0x68a   :  { %v2016_v13 = vpop.eup %2015  ;;  %v1163_v48 = vadd.f32 1.0, %v2014_v45  ;;  %2035 = vpow2.f32 %v1243_v42  ;;  %v1245_v49 = vmul.f32 -1.442695, %v1089_v6 }
 0x68b   :  { %v2018_v50 = vpop.eup %2017  ;;  %1205 = vst [vmem:[%s2659_s5 + $0x8] sm:$0xff] %v2016_v13  ;;  %2037 = vpow2.f32 %v1246_v47 }
 0x68c   :  { %v2020_v53 = vpop.eup %2019  ;;  %1204 = vst [vmem:[%s2659_s5] sm:$0xff] %v2018_v50  ;;  %2039 = vrcp.f32 %v1163_v48  ;;  %v1776_v54 = vpop.f32.mrb[46].mxu1 }
 0x68d   :  { %v2022_v55 = vpop.eup %2021  ;;  %v1162_v12 = vadd.f32 1.0, %v2020_v53  ;;  %2041 = vpow2.f32 %v1245_v49  ;;  %v1248_v18 = vmul.f32 -1.442695, %v1776_v54  ;;  %v1099_v34 = vpop.f32.mrb[47].mxu1 }
 0x68e   :  { %v2024_v19 = vpop.eup %2023  ;;  %v1165_v20 = vadd.f32 1.0, %v2022_v55  ;;  %v1247_v21 = vmul.f32 -1.442695, %v1099_v34 }
 0x68f   :  { %v2026_v33 = vpop.eup %2025  ;;  %1207 = vst [vmem:[%s2659_s5 + $0x18] sm:$0xff] %v2024_v19  ;;  %2043 = vrcp.f32 %v1162_v12 }
 0x690   :  { %v2028_v41 = vpop.eup %2027  ;;  %1206 = vst [vmem:[%s2659_s5 + $0x10] sm:$0xff] %v2026_v33  ;;  %2045 = vrcp.f32 %v1165_v20 }
 0x691   :  { %v2030_v22 = vpop.eup %2029  ;;  %v1164_v23 = vadd.f32 1.0, %v2028_v41  ;;  %2047 = vpow2.f32 %v1248_v18 }
 0x692   :  { %v2032_v24 = vpop.eup %2031  ;;  %v1167_v39 = vadd.f32 1.0, %v2030_v22  ;;  %2049 = vpow2.f32 %v1247_v21 }
 0x693   :  { %v2034_v40 = vpop.eup %2033  ;;  %1209 = vst [vmem:[%s2659_s5 + $0x28] sm:$0xff] %v2032_v24  ;;  %2051 = vrcp.f32 %v1164_v23 }
 0x694   :  { %v2036_v25 = vpop.eup %2035  ;;  %1208 = vst [vmem:[%s2659_s5 + $0x20] sm:$0xff] %v2034_v40  ;;  %2053 = vrcp.f32 %v1167_v39 }
 0x695   :  { %v2038_v46 = vpop.eup %2037  ;;  %v1166_v52 = vadd.f32 1.0, %v2036_v25 }
 0x696   :  { %v2040_v26 = vpop.eup %2039  ;;  %v1169_v51 = vadd.f32 1.0, %v2038_v46 }
 0x697   :  { %v2042_v27 = vpop.eup %2041  ;;  %1211 = vst [vmem:[%s2659_s5 + $0x38] sm:$0xff] %v2040_v26  ;;  %2055 = vrcp.f32 %v1166_v52 }
 0x698   :  { %2057 = vrcp.f32 %v1169_v51  ;;  %v1168_v28 = vadd.f32 1.0, %v2042_v27 }
 0x699   :  { %v2044_v29 = vpop.eup %2043 }
 0x69a   :  { %v2046_v30 = vpop.eup %2045  ;;  %1210 = vst [vmem:[%s2659_s5 + $0x30] sm:$0xff] %v2044_v29  ;;  %2059 = vrcp.f32 %v1168_v28 }
 0x69b   :  { %v2048_v31 = vpop.eup %2047  ;;  %1213 = vst [vmem:[%s2659_s5 + $0x48] sm:$0xff] %v2046_v30 }
 0x69c   :  { %v2050_v32 = vpop.eup %2049  ;;  %v1171_v56 = vadd.f32 1.0, %v2048_v31 }
 0x69d   :  { %v2052_v57 = vpop.eup %2051  ;;  %v1170_v58 = vadd.f32 1.0, %v2050_v32 }
 0x69e   :  { %v2054_v61 = vpop.eup %2053  ;;  %1212 = vst [vmem:[%s2659_s5 + $0x40] sm:$0xff] %v2052_v57  ;;  %2061 = vrcp.f32 %v1171_v56 }
 0x69f   :  { %1215 = vst [vmem:[%s2659_s5 + $0x58] sm:$0xff] %v2054_v61  ;;  %2063 = vrcp.f32 %v1170_v58 }
 0x6a1   :  { %v2056_v62 = vpop.eup %2055 }
 0x6a2   :  { %v2058_v63 = vpop.eup %2057  ;;  %1214 = vst [vmem:[%s2659_s5 + $0x50] sm:$0xff] %v2056_v62 }
 0x6a3   :  { %1217 = vst [vmem:[%s2659_s5 + $0x68] sm:$0xff] %v2058_v63 }
 0x6a4   :  { %v2060_v2 = vpop.eup %2059 }
 0x6a5   :  { %1216 = vst [vmem:[%s2659_s5 + $0x60] sm:$0xff] %v2060_v2 }
 0x6a8   :  { %v2062_v3 = vpop.eup %2061 }
 0x6a9   :  { %v2064_v4 = vpop.eup %2063  ;;  %1219 = vst [vmem:[%s2659_s5 + $0x78] sm:$0xff] %v2062_v3 }
 0x6aa   :  { %1218 = vst [vmem:[%s2659_s5 + $0x70] sm:$0xff] %v2064_v4 }

</bundles_post_ra>
